<compile_context>
chip_gen: v7x
topology: tpu7x:2x2x1
jax: 0.10.0
libtpu: 0.0.40
codegen_flags: <defaults>
</compile_context>

<pallas_src>
import math

import jax
import jax.numpy as jnp
from jax.experimental import pallas as pl
from jax.experimental.pallas import tpu as pltpu

_GELU_C = math.sqrt(2.0 / math.pi)


def _round_up(x, m):
    return (x + m - 1) // m * m


def _cdiv(a, b):
    return (a + b - 1) // b


# ---------------------------------------------------------------------------
# Kernels
# ---------------------------------------------------------------------------

def _fused_slice(x_ref, w1_ref, b1_ref, w2_ref):
    """One K-slice of the fused MLP: gelu(x @ W1[:, ks] + b1[ks]) @ W2[ks, :]."""
    h = jnp.dot(x_ref[...], w1_ref[...], preferred_element_type=jnp.float32)
    h = h + b1_ref[...]
    # gelu (exact tanh form from the reference). Cube written as h*(h*h): two
    # VPU muls; tanh lands on the EUP slot.
    inner = _GELU_C * h * (1.0 + 0.044715 * (h * h))
    h = 0.5 * h * (1.0 + jnp.tanh(inner))
    return jnp.dot(h.astype(w2_ref.dtype), w2_ref[...],
                   preferred_element_type=jnp.float32)


def _mlp_kernel_scratch(x_ref, w1_ref, b1_ref, w2_ref, b2_ref, o_ref, acc_ref):
    """Variant with a separate f32 accumulator (used when out dtype != f32)."""
    k = pl.program_id(1)

    @pl.when(k == 0)
    def _init():
        acc_ref[...] = jnp.zeros_like(acc_ref)

    acc_ref[...] += _fused_slice(x_ref, w1_ref, b1_ref, w2_ref)

    @pl.when(k == pl.num_programs(1) - 1)
    def _finalize():
        # Dropout is identity in eval mode.
        o_ref[...] = (acc_ref[...] + b2_ref[...]).astype(o_ref.dtype)


def _mlp_kernel_f32_out(x_ref, w1_ref, b1_ref, w2_ref, b2_ref, o_ref):
    """f32-output variant: accumulate directly into the resident output block."""
    k = pl.program_id(1)

    @pl.when(k == 0)
    def _init():
        o_ref[...] = jnp.zeros_like(o_ref)

    o_ref[...] += _fused_slice(x_ref, w1_ref, b1_ref, w2_ref)

    @pl.when(k == pl.num_programs(1) - 1)
    def _finalize():
        o_ref[...] += b2_ref[...]   # dropout is identity in eval mode


# ---------------------------------------------------------------------------
# Chip / tile selection helpers
# ---------------------------------------------------------------------------

def _chip_defaults():
    kind = ""
    try:
        kind = jax.devices()[0].device_kind.lower()
    except Exception:
        pass
    if ("v5 lite" in kind) or ("v5e" in kind) or ("v5lite" in kind):
        # v5e: 1 TC, 128 MiB VMEM, ~0.82 TB/s HBM -> break-even ~240 FLOP/byte.
        return dict(tm=512, vmem_cap=128 << 20, n_cores=1, extra_weight_buffers=True)
    if "7" in kind:
        # v7x: 2 TCs sharing ~3.2 TB/s HBM, only 64 MiB VMEM per TC.
        return dict(tm=1024, vmem_cap=64 << 20, n_cores=2, extra_weight_buffers=False)
    # Default / v6e: 1 TC, 128 MiB VMEM, ~1.4 TB/s HBM -> break-even ~640 FLOP/byte.
    return dict(tm=1024, vmem_cap=128 << 20, n_cores=1, extra_weight_buffers=False)


def _pick_tk(ns_pad, tk_max):
    """Largest multiple of 128 <= tk_max that divides ns_pad (ns_pad % 128 == 0)."""
    tk = max(128, min(tk_max, ns_pad) // 128 * 128)
    while ns_pad % tk != 0:
        tk -= 128
    return tk


def _vmem_footprint(tm, tk, nx_pad, x_itemsize, w_itemsize, out_itemsize,
                    use_scratch, weight_buffers):
    fp = 2 * tm * nx_pad * x_itemsize                     # x tile (double-buffered)
    fp += weight_buffers * nx_pad * tk * w_itemsize       # W1 K-slice
    fp += weight_buffers * tk * nx_pad * w_itemsize       # W2 K-slice
    fp += 2 * (tk + nx_pad) * 4                           # biases (f32)
    fp += 2 * tm * nx_pad * out_itemsize                  # out tile (double-buffered)
    if use_scratch:
        fp += tm * nx_pad * 4                             # f32 accumulator
    return fp


def _select_tiles(M, nx_pad, ns_pad, tm_default, tk_max, vmem_cap, n_cores,
                  x_itemsize, w_itemsize, out_itemsize, use_scratch,
                  weight_buffers):
    # Row tile: ~tm_default rows/step, balanced over ceil(M/tm_default) steps so
    # padded-row waste stays small.
    steps = max(1, _cdiv(M, tm_default))
    tm = _round_up(_cdiv(M, steps), 8)
    # v7x: guarantee >=2 steps along the "parallel" row axis so both TCs engage.
    if n_cores > 1:
        while _cdiv(M, tm) < min(2, _cdiv(M, 8)) and tm > 8:
            tm = _round_up(max(8, tm // 2), 8)

    # K tile: divisor of ns_pad (no rounding of n_state up to tk).
    tk = _pick_tk(ns_pad, tk_max)

    # VMEM budget check (matters mostly on v7x's 64 MiB): shrink tk first
    # (halving weight buffers at no extra total weight traffic), then tm.
    budget = int(vmem_cap * 0.75)
    while _vmem_footprint(tm, tk, nx_pad, x_itemsize, w_itemsize, out_itemsize,
                          use_scratch, weight_buffers) > budget:
        if tk > 128:
            tk = _pick_tk(ns_pad, tk - 128)
        elif tm > 8:
            tm = _round_up(max(8, tm // 2), 8)
        else:
            break
    return tm, tk


def _weight_spec(shape, index_map, extra_buffer):
    """BlockSpec for a streamed weight slice; 3-deep pipeline on v5e if supported."""
    if extra_buffer:
        try:
            return pl.BlockSpec(shape, index_map, pipeline_mode=pl.Buffered(3))
        except Exception:
            pass
    return pl.BlockSpec(shape, index_map)


# ---------------------------------------------------------------------------
# Public API
# ---------------------------------------------------------------------------

def prepare_mlp_params(w1, b1, w2, b2, *, compute_dtype=jnp.bfloat16):
    """Hoisted (once-per-model) weight cast + lane padding.

    w1: (nx, n_state)  b1: (n_state,)  w2: (n_state, nx)  b2: (nx,)
    Weights are cast to `compute_dtype` (bf16 MXU inputs, f32 accumulation);
    this is an intentional precision change vs the f32 PyTorch module.
    """
    nx, n_state = w1.shape
    nx_pad = _round_up(nx, 128)
    ns_pad = _round_up(n_state, 128)

    def _cast(a, dt):
        return a if a.dtype == jnp.dtype(dt) else a.astype(dt)

    w1p = _cast(w1, compute_dtype)
    w2p = _cast(w2, compute_dtype)
    if nx_pad != nx or ns_pad != n_state:
        w1p = jnp.pad(w1p, ((0, nx_pad - nx), (0, ns_pad - n_state)))
        w2p = jnp.pad(w2p, ((0, ns_pad - n_state), (0, nx_pad - nx)))

    b1p = _cast(b1, jnp.float32)
    b2p = _cast(b2, jnp.float32)
    if ns_pad != n_state:
        b1p = jnp.pad(b1p, (0, ns_pad - n_state))
    if nx_pad != nx:
        b2p = jnp.pad(b2p, (0, nx_pad - nx))

    return dict(w1=w1p, b1=b1p.reshape(1, ns_pad), w2=w2p, b2=b2p.reshape(1, nx_pad),
                nx=nx, n_state=n_state, nx_pad=nx_pad, ns_pad=ns_pad,
                compute_dtype=jnp.dtype(compute_dtype))


def mlp_forward(x, params, *, tm=None, tk_max=512, out_dtype=None,
                vmem_limit_bytes=None):
    """x: (..., nx); params from prepare_mlp_params. Returns (..., nx)."""
    nx, n_state = params["nx"], params["n_state"]
    nx_pad, ns_pad = params["nx_pad"], params["ns_pad"]
    compute_dtype = params["compute_dtype"]
    w1p, b1p, w2p, b2p = params["w1"], params["b1"], params["w2"], params["b2"]

    if out_dtype is None:
        out_dtype = x.dtype
    out_dtype = jnp.dtype(out_dtype)
    orig_shape = x.shape
    assert orig_shape[-1] == nx, "last dim of x must equal nx"
    M = 1
    for d in orig_shape[:-1]:
        M *= int(d)

    chip = _chip_defaults()
    weight_buffers = 3 if chip["extra_weight_buffers"] else 2
    use_scratch = out_dtype != jnp.dtype(jnp.float32)
    tm_default = int(tm) if tm is not None else chip["tm"]

    tm, tk = _select_tiles(
        M, nx_pad, ns_pad, tm_default, tk_max, chip["vmem_cap"], chip["n_cores"],
        compute_dtype.itemsize, compute_dtype.itemsize, out_dtype.itemsize,
        use_scratch, weight_buffers)

    m_pad = _round_up(M, tm)

    # x: reshape is free; cast/pad only if actually needed.
    x2d = x.reshape(M, nx)
    if x2d.dtype != compute_dtype:
        x2d = x2d.astype(compute_dtype)
    if m_pad != M or nx_pad != nx:
        x2d = jnp.pad(x2d, ((0, m_pad - M), (0, nx_pad - nx)))

    grid = (m_pad // tm, ns_pad // tk)

    footprint = _vmem_footprint(tm, tk, nx_pad, compute_dtype.itemsize,
                                compute_dtype.itemsize, out_dtype.itemsize,
                                use_scratch, weight_buffers)
    if vmem_limit_bytes is None:
        vmem_limit_bytes = min(int(chip["vmem_cap"] * 0.9),
                               max(footprint + (8 << 20), 32 << 20))

    def _nbytes(a):
        return a.size * a.dtype.itemsize

    # Weights are re-streamed once per row tile; x/out move once.
    cost = pl.CostEstimate(
        flops=4 * m_pad * nx_pad * ns_pad,
        transcendentals=m_pad * ns_pad,
        bytes_accessed=(_nbytes(x2d)
                        + grid[0] * (_nbytes(w1p) + _nbytes(w2p)
                                     + _nbytes(b1p) + _nbytes(b2p))
                        + m_pad * nx_pad * out_dtype.itemsize),
    )

    kernel = _mlp_kernel_scratch if use_scratch else _mlp_kernel_f32_out
    scratch = [pltpu.VMEM((tm, nx_pad), jnp.float32)] if use_scratch else []

    out2d = pl.pallas_call(
        kernel,
        out_shape=jax.ShapeDtypeStruct((m_pad, nx_pad), out_dtype),
        grid_spec=pltpu.PrefetchScalarGridSpec(
            num_scalar_prefetch=0,
            grid=grid,
            in_specs=[
                pl.BlockSpec((tm, nx_pad), lambda i, k: (i, 0)),        # x rows (resident over k)
                _weight_spec((nx_pad, tk), lambda i, k: (0, k),
                             chip["extra_weight_buffers"]),             # W1 K-slice
                pl.BlockSpec((1, tk), lambda i, k: (0, k)),             # b1 K-slice
                _weight_spec((tk, nx_pad), lambda i, k: (k, 0),
                             chip["extra_weight_buffers"]),             # W2 K-slice
                pl.BlockSpec((1, nx_pad), lambda i, k: (0, 0)),         # b2
            ],
            out_specs=pl.BlockSpec((tm, nx_pad), lambda i, k: (i, 0)),
            scratch_shapes=scratch,
        ),
        compiler_params=pltpu.CompilerParams(
            dimension_semantics=("parallel", "arbitrary"),
            vmem_limit_bytes=int(vmem_limit_bytes),
        ),
        cost_estimate=cost,
    )(x2d, w1p, b1p, w2p, b2p)

    if m_pad != M or nx_pad != nx:
        out2d = out2d[:M, :nx]
    return out2d.reshape(*orig_shape[:-1], nx)


def reference_mlp(x2d, w1, b1, w2, b2):
    h = x2d @ w1 + b1
    h = 0.5 * h * (1.0 + jnp.tanh(_GELU_C * (h + 0.044715 * h ** 3)))
    return h @ w2 + b2


if __name__ == "__main__":
    # --- small shapes consistent with the module: n_embd=32, n_state=4*n_embd ---
    B, T, nx = 2, 8, 32
    n_state = 4 * nx

    key = jax.random.PRNGKey(0)
    kx, kw1, kw2 = jax.random.split(key, 3)

    x = jax.random.normal(kx, (B, T, nx), dtype=jnp.float32)
    w1 = 0.02 * jax.random.normal(kw1, (nx, n_state), dtype=jnp.float32)
    b1 = jnp.zeros((n_state,), dtype=jnp.float32)
    w2 = 0.02 * jax.random.normal(kw2, (n_state, nx), dtype=jnp.float32)
    b2 = jnp.zeros((nx,), dtype=jnp.float32)

    params = prepare_mlp_params(w1, b1, w2, b2)   # hoisted cast + pad (once)

    out = jax.block_until_ready(mlp_forward(x, params))
    ref = reference_mlp(x.reshape(-1, nx), w1, b1, w2, b2).reshape(B, T, nx)
    assert out.shape == ref.shape and out.dtype == jnp.float32
    # bf16 MXU inputs vs f32 reference -> loose tolerance.
    assert jnp.allclose(out, ref, atol=1e-2, rtol=1e-2), "small-shape mismatch vs reference"

    # bf16 activations/output -> exercises the scratch-accumulator kernel variant.
    out_bf16 = jax.block_until_ready(mlp_forward(x.astype(jnp.bfloat16), params))
    assert out_bf16.dtype == jnp.bfloat16
    assert jnp.allclose(out_bf16.astype(jnp.float32), ref, atol=5e-2, rtol=5e-2), \
        "bf16-output mismatch vs reference"

    # --- a modest shape exercising the row grid, the n_state reduction axis,
    #     the f32 accumulation and lane/row padding (nx=160 -> 256; n_state=640
    #     pads only to 640, tk=128 -> 5 K steps, no zero-multiply waste) ---
    B2, T2, nx2 = 4, 96, 160
    ns2 = 4 * nx2
    k2 = jax.random.PRNGKey(1)
    kx2, ka, kb, kc, kd = jax.random.split(k2, 5)
    x2 = jax.random.normal(kx2, (B2, T2, nx2), dtype=jnp.float32)
    w1b = 0.02 * jax.random.normal(ka, (nx2, ns2), dtype=jnp.float32)
    b1b = 0.02 * jax.random.normal(kb, (ns2,), dtype=jnp.float32)
    w2b = 0.02 * jax.random.normal(kc, (ns2, nx2), dtype=jnp.float32)
    b2b = 0.02 * jax.random.normal(kd, (nx2,), dtype=jnp.float32)

    params2 = prepare_mlp_params(w1b, b1b, w2b, b2b)
    out2 = jax.block_until_ready(mlp_forward(x2, params2))
    ref2 = reference_mlp(x2.reshape(-1, nx2), w1b, b1b, w2b, b2b).reshape(B2, T2, nx2)
    assert jnp.allclose(out2, ref2, atol=2e-2, rtol=2e-2), "tiled-shape mismatch vs reference"

    print("KERNEL_OK")
</pallas_src>

<mosaic_0001>
module attributes {stable_mosaic.version = 11 : i64} {
  func.func @_mlp_kernel_f32_out(%arg0: i32, %arg1: i32, %arg2: memref<16x128xbf16, #tpu.memory_space<vmem>>, %arg3: memref<128x128xbf16, #tpu.memory_space<vmem>>, %arg4: memref<1x128xf32, #tpu.memory_space<vmem>>, %arg5: memref<128x128xbf16, #tpu.memory_space<vmem>>, %arg6: memref<1x128xf32, #tpu.memory_space<vmem>>, %arg7: memref<16x128xf32, #tpu.memory_space<vmem>>) attributes {dimension_semantics = [#tpu.dimension_semantics<parallel>, #tpu.dimension_semantics<arbitrary>], iteration_bounds = array<i64: 1, 1>, scalar_prefetch = 0 : i64, scratch_operands = 0 : i64, tpu.core_type = #tpu.core_type<tc>, window_params = [{transform_indices = @transform_0, window_bounds = array<i64: 16, 128>}, {transform_indices = @transform_1, window_bounds = array<i64: 128, 128>}, {transform_indices = @transform_2, window_bounds = array<i64: 1, 128>}, {transform_indices = @transform_3, window_bounds = array<i64: 128, 128>}, {pipeline_mode = #tpu.pipeline_mode<synchronous>, transform_indices = @transform_4, window_bounds = array<i64: 1, 128>}, {transform_indices = @transform_5, window_bounds = array<i64: 16, 128>}]} {
    %c0_i32 = arith.constant 0 : i32
    %0 = arith.cmpi eq, %arg1, %c0_i32 : i32
    %1 = arith.extui %0 : i1 to i32
    %c0_i32_0 = arith.constant 0 : i32
    %2 = arith.cmpi ne, %1, %c0_i32_0 : i32
    scf.if %2 {
      %cst_20 = arith.constant 0.000000e+00 : f32
      %32 = vector.broadcast %cst_20 : f32 to vector<16x128xf32>
      %c0_21 = arith.constant 0 : index
      %c0_22 = arith.constant 0 : index
      %33 = vector.load %arg7[%c0_21, %c0_22] : memref<16x128xf32, #tpu.memory_space<vmem>>, vector<16x128xf32>
      tpu.vector_store %arg7[%c0_21, %c0_22], %32 {strides = array<i32>} : memref<16x128xf32, #tpu.memory_space<vmem>>, vector<16x128xf32>,
    } else {
    }
    %c0 = arith.constant 0 : index
    %c0_1 = arith.constant 0 : index
    %3 = vector.load %arg7[%c0, %c0_1] : memref<16x128xf32, #tpu.memory_space<vmem>>, vector<16x128xf32>
    %c0_2 = arith.constant 0 : index
    %c0_3 = arith.constant 0 : index
    %4 = vector.load %arg2[%c0_2, %c0_3] : memref<16x128xbf16, #tpu.memory_space<vmem>>, vector<16x128xbf16>
    %c0_4 = arith.constant 0 : index
    %c0_5 = arith.constant 0 : index
    %5 = vector.load %arg3[%c0_4, %c0_5] : memref<128x128xbf16, #tpu.memory_space<vmem>>, vector<128x128xbf16>
    %cst = arith.constant dense<0.000000e+00> : vector<16x128xf32>
    %6 = tpu.matmul %4, %5, %cst {dimension_numbers = #tpu.dot_dimension_numbers<[1], [0], [0], [1], [0, 0, 1, 1], [], []>} : vector<16x128xbf16>, vector<128x128xbf16>, vector<16x128xf32> -> vector<16x128xf32>
    %c0_6 = arith.constant 0 : index
    %c0_7 = arith.constant 0 : index
    %7 = vector.load %arg4[%c0_6, %c0_7] : memref<1x128xf32, #tpu.memory_space<vmem>>, vector<1x128xf32>
    %8 = vector.broadcast %7 : vector<1x128xf32> to vector<16x128xf32>
    %9 = arith.addf %6, %8 : vector<16x128xf32>
    %cst_8 = arith.constant 0.797884583 : f32
    %10 = vector.broadcast %cst_8 : f32 to vector<16x128xf32>
    %11 = arith.mulf %10, %9 : vector<16x128xf32>
    %12 = arith.mulf %9, %9 : vector<16x128xf32>
    %cst_9 = arith.constant 4.471500e-02 : f32
    %13 = vector.broadcast %cst_9 : f32 to vector<16x128xf32>
    %14 = arith.mulf %13, %12 : vector<16x128xf32>
    %cst_10 = arith.constant 1.000000e+00 : f32
    %15 = vector.broadcast %cst_10 : f32 to vector<16x128xf32>
    %16 = arith.addf %15, %14 : vector<16x128xf32>
    %17 = arith.mulf %11, %16 : vector<16x128xf32>
    %cst_11 = arith.constant 5.000000e-01 : f32
    %18 = vector.broadcast %cst_11 : f32 to vector<16x128xf32>
    %19 = arith.mulf %18, %9 : vector<16x128xf32>
    %20 = math.tanh %17 : vector<16x128xf32>
    %cst_12 = arith.constant 1.000000e+00 : f32
    %21 = vector.broadcast %cst_12 : f32 to vector<16x128xf32>
    %22 = arith.addf %21, %20 : vector<16x128xf32>
    %23 = arith.mulf %19, %22 : vector<16x128xf32>
    %24 = arith.truncf %23 : vector<16x128xf32> to vector<16x128xbf16>
    %c0_13 = arith.constant 0 : index
    %c0_14 = arith.constant 0 : index
    %25 = vector.load %arg5[%c0_13, %c0_14] : memref<128x128xbf16, #tpu.memory_space<vmem>>, vector<128x128xbf16>
    %cst_15 = arith.constant dense<0.000000e+00> : vector<16x128xf32>
    %26 = tpu.matmul %24, %25, %cst_15 {dimension_numbers = #tpu.dot_dimension_numbers<[1], [0], [0], [1], [0, 0, 1, 1], [], []>} : vector<16x128xbf16>, vector<128x128xbf16>, vector<16x128xf32> -> vector<16x128xf32>
    %27 = arith.addf %3, %26 : vector<16x128xf32>
    %c0_16 = arith.constant 0 : index
    %c0_17 = arith.constant 0 : index
    %28 = vector.load %arg7[%c0_16, %c0_17] : memref<16x128xf32, #tpu.memory_space<vmem>>, vector<16x128xf32>
    tpu.vector_store %arg7[%c0_16, %c0_17], %27 {strides = array<i32>} : memref<16x128xf32, #tpu.memory_space<vmem>>, vector<16x128xf32>,
    %c0_i32_18 = arith.constant 0 : i32
    %29 = arith.cmpi eq, %arg1, %c0_i32_18 : i32
    %30 = arith.extui %29 : i1 to i32
    %c0_i32_19 = arith.constant 0 : i32
    %31 = arith.cmpi ne, %30, %c0_i32_19 : i32
    scf.if %31 {
      %c0_20 = arith.constant 0 : index
      %c0_21 = arith.constant 0 : index
      %32 = vector.load %arg7[%c0_20, %c0_21] : memref<16x128xf32, #tpu.memory_space<vmem>>, vector<16x128xf32>
      %c0_22 = arith.constant 0 : index
      %c0_23 = arith.constant 0 : index
      %33 = vector.load %arg6[%c0_22, %c0_23] : memref<1x128xf32, #tpu.memory_space<vmem>>, vector<1x128xf32>
      %34 = vector.broadcast %33 : vector<1x128xf32> to vector<16x128xf32>
      %35 = arith.addf %32, %34 : vector<16x128xf32>
      %c0_24 = arith.constant 0 : index
      %c0_25 = arith.constant 0 : index
      %36 = vector.load %arg7[%c0_24, %c0_25] : memref<16x128xf32, #tpu.memory_space<vmem>>, vector<16x128xf32>
      tpu.vector_store %arg7[%c0_24, %c0_25], %35 {strides = array<i32>} : memref<16x128xf32, #tpu.memory_space<vmem>>, vector<16x128xf32>,
    } else {
    }
    return
  }
  func.func @transform_0(%arg0: i32, %arg1: i32) -> (i32, i32) {
    %c0_i32 = arith.constant 0 : i32
    %c0_i32_0 = arith.constant 0 : i32
    return %arg0, %c0_i32 : i32, i32
  }
  func.func @transform_1(%arg0: i32, %arg1: i32) -> (i32, i32) {
    %c0_i32 = arith.constant 0 : i32
    %c0_i32_0 = arith.constant 0 : i32
    return %c0_i32, %arg1 : i32, i32
  }
  func.func @transform_2(%arg0: i32, %arg1: i32) -> (i32, i32) {
    %c0_i32 = arith.constant 0 : i32
    %c0_i32_0 = arith.constant 0 : i32
    return %c0_i32, %arg1 : i32, i32
  }
  func.func @transform_3(%arg0: i32, %arg1: i32) -> (i32, i32) {
    %c0_i32 = arith.constant 0 : i32
    %c0_i32_0 = arith.constant 0 : i32
    return %arg1, %c0_i32 : i32, i32
  }
  func.func @transform_4(%arg0: i32, %arg1: i32) -> (i32, i32) {
    %c0_i32 = arith.constant 0 : i32
    %c0_i32_0 = arith.constant 0 : i32
    %c0_i32_1 = arith.constant 0 : i32
    return %c0_i32, %c0_i32_0 : i32, i32
  }
  func.func @transform_5(%arg0: i32, %arg1: i32) -> (i32, i32) {
    %c0_i32 = arith.constant 0 : i32
    %c0_i32_0 = arith.constant 0 : i32
    return %arg0, %c0_i32 : i32, i32
  }
}

</mosaic_0001>

<bundles_post_ra>
// kernel: tpu_custom_call.1
= control target key start
LH: loop header
LB: loop body
LE: loop exit
PB: predicated region body
PF: predicated region fallthrough
CT: control target
= control target key end

     0   :  { %10 = vsyncpa [#allocation3], 0  ;;  %s665_s0 = inlined_call_operand.hbm [shape: bf16[16,128], index: 0, kind: input, shape index: {}]   ;;  %s666_s1 = inlined_call_operand.hbm [shape: bf16[128,128], index: 1, kind: input, shape index: {}]   ;;  %s667_s2 = inlined_call_operand.vmem [shape: f32[1,128], index: 2, kind: input, shape index: {}]   ;;  %s668_s3 = inlined_call_operand.hbm [shape: bf16[128,128], index: 3, kind: input, shape index: {}]   ;;  %s669_s4 = inlined_call_operand.vmem [shape: f32[1,128], index: 4, kind: input, shape index: {}]   ;;  %s670_s5 = inlined_call_operand.hbm [shape: f32[16,128], index: 5, kind: output, shape index: {}]  }
   0x1   :  { %11 = vsyncpa [#allocation6], 0 }
   0x2   :  { %12 = vsyncpa [#allocation4], 0  ;;  %s555_s18 = smov [#allocation5]   ;;  %s556_s20 = smov [#allocation2]  }
   0x3   :  { %s30_s19 = sshll.u32 %s555_s18, 4  ;;  %s18_s21 = sshll.u32 %s556_s20, 4  ;;  %s31_s19 = int_to_ptr.vmem [resolvable:$true] %s30_s19  ;;  %s595_s21 = int_to_ptr.vmem [resolvable:$true] %s18_s21 }
   0x4   :  { %s461_s24 = scalar_lea.hbm %s666_s1, 1024 }
   0x5   :  { %p462_p0 = scmp.ne.s32.totalorder %s666_s1, %s461_s24  ;;  %p465_p1 = scmp.lt.u32.totalorder %s461_s24, %s666_s1 }
   0x7   :  { %p467_p2 = pnand %p465_p1, %p462_p0 }
   0x9   :  { %470 = shalt.err (!%p467_p2)
}
   0xa   :  { %s471_s29 = scalar_lea.vmem %s31_s19, 1024  ;;  %p476_p4 = scmp.lt.s32.totalorder %s31_s19, %s31_s19 }
   0xb   :  { %p472_p3 = scmp.ne.s32.totalorder %s31_s19, %s471_s29  ;;  %p477_p5 = scmp.lt.s32.totalorder %s471_s29, %s471_s29 }
   0xd   :  { %p478_p6 = por %p477_p5, %p476_p4 }
   0xf   :  { %p479_p7 = pnand %p478_p6, %p472_p3 }
  0x11   :  { %482 = shalt.err (!%p479_p7)
}
  0x12   :  { %s557_s30 = smov 64   ;;  %s558_s6 = smov 4  }
  0x13   :  { %36 = dma.hbm_to_vmem [thread:$0]  %s666_s1, 1024, %s31_s19, [#allocation6], %s557_s30, %s557_s30, %s558_s6  }
  0x14   :  { %s483_s11 = scalar_lea.hbm %s665_s0, 128 }
  0x15   :  { %p484_p8 = scmp.ne.s32.totalorder %s665_s0, %s483_s11  ;;  %p487_p9 = scmp.lt.u32.totalorder %s483_s11, %s665_s0 }
  0x17   :  { %p489_p10 = pnand %p487_p9, %p484_p8 }
  0x19   :  { %492 = shalt.err (!%p489_p10)
}
  0x1a   :  { %s493_s16 = scalar_lea.vmem %s595_s21, 128  ;;  %p498_p12 = scmp.lt.s32.totalorder %s595_s21, %s595_s21 }
  0x1b   :  { %p494_p11 = scmp.ne.s32.totalorder %s595_s21, %s493_s16  ;;  %p499_p13 = scmp.lt.s32.totalorder %s493_s16, %s493_s16 }
  0x1d   :  { %p500_p0 = por %p499_p13, %p498_p12 }
  0x1f   :  { %p501_p1 = pnand %p500_p0, %p494_p11 }
  0x21   :  { %504 = shalt.err (!%p501_p1)
}
  0x22   :  { %24 = dma.hbm_to_vmem [thread:$0]  %s665_s0, 128, %s595_s21, [#allocation3], %s557_s30, %s557_s30, %s558_s6  }
  0x23   :  { %s559_s18 = smov [#allocation7]   ;;  %s505_s23 = scalar_lea.hbm %s668_s3, 1024 }
  0x24   :  { %s44_s19 = sshll.u32 %s559_s18, 4  ;;  %p506_p2 = scmp.ne.s32.totalorder %s668_s3, %s505_s23  ;;  %s45_s19 = int_to_ptr.vmem [resolvable:$true] %s44_s19 }
  0x25   :  { %p509_p3 = scmp.lt.u32.totalorder %s505_s23, %s668_s3 }
  0x27   :  { %p511_p4 = pnand %p509_p3, %p506_p2 }
  0x29   :  { %514 = shalt.err (!%p511_p4)
}
  0x2a   :  { %s515_s28 = scalar_lea.vmem %s45_s19, 1024  ;;  %p520_p6 = scmp.lt.s32.totalorder %s45_s19, %s45_s19 }
  0x2b   :  { %p516_p5 = scmp.ne.s32.totalorder %s45_s19, %s515_s28  ;;  %p521_p7 = scmp.lt.s32.totalorder %s515_s28, %s515_s28 }
  0x2d   :  { %p522_p8 = por %p521_p7, %p520_p6 }
  0x2f   :  { %p523_p9 = pnand %p522_p8, %p516_p5 }
  0x31   :  { %526 = shalt.err (!%p523_p9)
}
  0x32   :  { %50 = dma.hbm_to_vmem [thread:$0]  %s668_s3, 1024, %s45_s19, [#allocation6], %s557_s30, %s557_s30, %s558_s6  }
  0x33   :  { %549 = dma.done.wait [#allocation3], 128  }
  0x34   :  { %550 = vsyncadd [#allocation3], 4294967168 }
  0x35   :  { %551 = dma.done.wait [#allocation6], 2048  }
  0x36   :  { %552 = vsyncadd [#allocation6], 4294965248  ;;  %v560_v0 = vmov 0.0   ;;  %vm561_vm0 = vmmov 0   ;;  %v440_v1 = vld [vmem:[#allocation5] sm:$0xff]   ;;  %v441_v2 = vld [vmem:[#allocation5 + $0x8] sm:$0xff]  }
  0x37   :  { %390 = vmatprep.subr.bf16.mxu0 %v560_v0  ;;  %406 = vmatprep.mubr.msk.bf16.mxu0 %vm561_vm0, %v560_v0  ;;  %v442_v3 = vld [vmem:[#allocation5 + $0x10] sm:$0xff]   ;;  %v449_v4 = vld [vmem:[#allocation7] sm:$0xff]   ;;  %v443_v5 = vld [vmem:[#allocation5 + $0x18] sm:$0xff]   ;;  %s562_s6 = smov [#allocation8]  }
  0x38   :  { %410 = vmatprep.subr.bf16.mxu1 %v560_v0  ;;  %426 = vmatprep.mubr.msk.bf16.mxu1 %vm561_vm0, %v560_v0  ;;  %v444_v6 = vld [vmem:[#allocation5 + $0x20] sm:$0xff]   ;;  %v445_v7 = vld [vmem:[#allocation5 + $0x28] sm:$0xff]   ;;  %v446_v8 = vld [vmem:[#allocation5 + $0x30] sm:$0xff]   ;;  %s340_s7 = sshll.u32 %s562_s6, 4  ;;  %s341_s7 = int_to_ptr.vmem [resolvable:$true] %s340_s7 }
  0x39   :  { %391 = vmatpush3.bf16.msra.mxu0 %v440_v1  ;;  %411 = vmatpush3.bf16.msra.mxu1 %v449_v4  ;;  %v447_v9 = vld [vmem:[#allocation5 + $0x38] sm:$0xff]   ;;  %v450_v11 = vld [vmem:[#allocation7 + $0x8] sm:$0xff]   ;;  %v451_v12 = vld [vmem:[#allocation7 + $0x10] sm:$0xff]   ;;  %s527_s8 = scalar_lea.vmem %s341_s7, 256  ;;  %p532_p11 = scmp.lt.s32.totalorder %s341_s7, %s341_s7 }
  0x3a   :  { %392 = vmatprep.subr.bf16.mxu0 %v560_v0  ;;  %412 = vmatprep.subr.bf16.mxu1 %v560_v0  ;;  %v448_v10 = vld [vmem:[#allocation2] sm:$0xff]   ;;  %v453_v14 = vld [vmem:[#allocation7 + $0x20] sm:$0xff]   ;;  %v454_v15 = vld [vmem:[#allocation7 + $0x28] sm:$0xff]   ;;  %p528_p10 = scmp.ne.s32.totalorder %s341_s7, %s527_s8  ;;  %p533_p12 = scmp.lt.s32.totalorder %s527_s8, %s527_s8 }
  0x3b   :  { %v452_v13 = vld [vmem:[#allocation7 + $0x18] sm:$0xff]   ;;  %v455_v16 = vld [vmem:[#allocation7 + $0x30] sm:$0xff]  }
  0x3c   :  { %v456_v17 = vld [vmem:[#allocation7 + $0x38] sm:$0xff]   ;;  %p534_p13 = por %p533_p12, %p532_p11 }
  0x3d   :  { %393 = vmatpush3.bf16.msra.mxu0 %v441_v2  ;;  %413 = vmatpush3.bf16.msra.mxu1 %v450_v11  ;;  %v353_v18 = vld [vmem:[%s667_s2] ss:$0 sm:$0xff] }
  0x3e   :  { %394 = vmatprep.subr.bf16.mxu0 %v560_v0  ;;  %414 = vmatprep.subr.bf16.mxu1 %v560_v0  ;;  %v371_v45 = vld [vmem:[%s669_s4] ss:$0 sm:$0xff]  ;;  %p535_p0 = pnand %p534_p13, %p528_p10 }
  0x41   :  { %395 = vmatpush3.bf16.msra.mxu0 %v442_v3  ;;  %415 = vmatpush3.bf16.msra.mxu1 %v451_v12 }
  0x42   :  { %396 = vmatprep.subr.bf16.mxu0 %v560_v0  ;;  %416 = vmatprep.subr.bf16.mxu1 %v560_v0 }
  0x45   :  { %397 = vmatpush3.bf16.msra.mxu0 %v443_v5  ;;  %417 = vmatpush3.bf16.msra.mxu1 %v452_v13 }
  0x46   :  { %398 = vmatprep.subr.bf16.mxu0 %v560_v0  ;;  %418 = vmatprep.subr.bf16.mxu1 %v560_v0 }
  0x49   :  { %399 = vmatpush3.bf16.msra.mxu0 %v444_v6  ;;  %419 = vmatpush3.bf16.msra.mxu1 %v453_v14 }
  0x4a   :  { %400 = vmatprep.subr.bf16.mxu0 %v560_v0  ;;  %420 = vmatprep.subr.bf16.mxu1 %v560_v0 }
  0x4d   :  { %401 = vmatpush3.bf16.msra.mxu0 %v445_v7  ;;  %421 = vmatpush3.bf16.msra.mxu1 %v454_v15 }
  0x4e   :  { %402 = vmatprep.subr.bf16.mxu0 %v560_v0  ;;  %422 = vmatprep.subr.bf16.mxu1 %v560_v0 }
  0x51   :  { %403 = vmatpush3.bf16.msra.mxu0 %v446_v8  ;;  %423 = vmatpush3.bf16.msra.mxu1 %v455_v16 }
  0x52   :  { %404 = vmatprep.subr.bf16.mxu0 %v560_v0  ;;  %424 = vmatprep.subr.bf16.mxu1 %v560_v0 }
  0x55   :  { %405 = vmatpush3.bf16.msra.mxu0 %v447_v9  ;;  %425 = vmatpush3.bf16.msra.mxu1 %v456_v17 }
  0x58   :  { %407 = vmatmul.mubr.bf16.vlgmr.msra.gmra.mrb[0].mxu0 %v448_v10 }
 0x12b   :  { %v184_v19 = vpop.f32.mrb[0].mxu0 }
 0x12c   :  { %v185_v20 = vadd.f32 %v353_v18, %v184_v19  ;;  %v408_v21 = vpop.f32.mrb[1].mxu0 }
 0x12d   :  { %v187_v22 = vpop.f32.mrb[2].mxu0 }
 0x12e   :  { %v193_v23 = vmul.f32 %v185_v20, %v185_v20  ;;  %v188_v24 = vadd.f32 %v353_v18, %v187_v22  ;;  %v409_v25 = vpop.f32.mrb[3].mxu0  ;;  %v191_v28 = vmul.f32 0.7978846, %v185_v20  ;;  %v201_v38 = vmul.f32 0.5, %v185_v20 }
 0x130   :  { %v195_v26 = vmul.f32 0.044715, %v193_v23  ;;  %v194_v27 = vmul.f32 %v188_v24, %v188_v24  ;;  %v192_v32 = vmul.f32 0.7978846, %v188_v24  ;;  %v202_v39 = vmul.f32 0.5, %v188_v24 }
 0x132   :  { %v197_v29 = vadd.f32 1.0, %v195_v26  ;;  %v196_v30 = vmul.f32 0.044715, %v194_v27 }
 0x134   :  { %v199_v31 = vmul.f32 %v197_v29, %v191_v28  ;;  %v198_v33 = vadd.f32 1.0, %v196_v30 }
 0x136   :  { %457 = vtanh.f32 %v199_v31  ;;  %v200_v34 = vmul.f32 %v198_v33, %v192_v32 }
 0x138   :  { %459 = vtanh.f32 %v200_v34 }
 0x140   :  { %v458_v35 = vpop.eup %457 }
 0x141   :  { %v205_v36 = vadd.f32 1.0, %v458_v35 }
 0x142   :  { %v460_v37 = vpop.eup %459 }
 0x143   :  { %v206_v40 = vadd.f32 1.0, %v460_v37  ;;  %v207_v41 = vmul.f32 %v205_v36, %v201_v38 }
 0x145   :  { %v208_v42 = vmul.f32 %v206_v40, %v202_v39 }
 0x147   :  { %v209_v43 = vpack.c.bf16 %v208_v42, %v207_v41 }
 0x149   :  { %427 = vmatmul.mubr.bf16.vlgmr.msra.gmra.mrb[0].mxu1 %v209_v43 }
 0x21c   :  { %v308_v44 = vpop.f32.mrb[0].mxu1 }
 0x21d   :  { %v428_v46 = vpop.f32.mrb[1].mxu1  ;;  %v331_v49 = vadd.f32 %v371_v45, %v308_v44 }
 0x21e   :  { %v311_v47 = vpop.f32.mrb[2].mxu1 }
 0x21f   :  { %v429_v48 = vpop.f32.mrb[3].mxu1  ;;  %v332_v50 = vadd.f32 %v371_v45, %v311_v47  ;;  %333 = vst [vmem:[#allocation8] sm:$0xff] %v331_v49 }
 0x221   :  { %334 = vst [vmem:[#allocation8 + $0x8] sm:$0xff] %v332_v50 }
 0x222   :  { %538 = shalt.err (!%p535_p0)
}
 0x223   :  { %s539_s4 = scalar_lea.hbm %s670_s5, 256 }
 0x224   :  { %p540_p1 = scmp.ne.s32.totalorder %s670_s5, %s539_s4  ;;  %p543_p2 = scmp.lt.u32.totalorder %s539_s4, %s670_s5 }
 0x226   :  { %p545_p3 = pnand %p543_p2, %p540_p1 }
 0x228   :  { %548 = shalt.err (!%p545_p3)
}
 0x229   :  { %s563_s15 = smov 128   ;;  %s564_s16 = smov 8  }
 0x22a   :  { %346 = dma.vmem_to_hbm [thread:$0]  %s341_s7, 256, %s670_s5, [#allocation4], %s563_s15, %s563_s15, %s564_s16  }
 0x22b   :  { %553 = dma.done.wait [#allocation4], 256  }
 0x22c   :  { %554 = vsyncadd [#allocation4], 4294967040 }
 0x22d   :  { %350 = vsyncpa [#allocation3], 1 }
 0x22e   :  { %351 = vsyncpa [#allocation6], 1 }
 0x22f   :  { %352 = vsyncpa [#allocation4], 1 }

</bundles_post_ra>
